<compile_context>
chip_gen: v7x
topology: tpu7x:2x2x1
jax: 0.10.0
libtpu: 0.0.40
codegen_flags: <defaults>
</compile_context>

<pallas_src>
import functools

import jax
import jax.numpy as jnp
from jax import lax
from jax.experimental import pallas as pl
from jax.experimental.pallas import tpu as pltpu

_MIB = 1024 * 1024


def _round_up(x, m):
    return (x + m - 1) // m * m


def _layernorm(rows_f32, gamma_ref, beta_ref, eps, do_ln):
    """Biased-variance LayerNorm over the last dim (torch semantics)."""
    if not do_ln:
        return rows_f32
    mean = jnp.mean(rows_f32, axis=-1, keepdims=True)
    var = jnp.mean((rows_f32 - mean) ** 2, axis=-1, keepdims=True)
    rows = (rows_f32 - mean) * lax.rsqrt(var + eps)          # rsqrt -> EUP slot
    return rows * gamma_ref[...] + beta_ref[...]             # (1, H) broadcast


def _embed_ln_vmem_kernel(ids_ref, w_ref, gamma_ref, beta_ref, out_ref, *,
                          eps, do_ln):
    """Fast path: table resident in VMEM; gather = one-hot matmul on the MXU."""
    ids = ids_ref[...]                                        # (tb, 1) int32
    tb = ids.shape[0]
    v = w_ref.shape[0]
    cols = lax.broadcasted_iota(jnp.int32, (tb, v), 1)
    onehot = (cols == ids).astype(w_ref.dtype)                # exactly 0/1
    rows = jnp.dot(onehot, w_ref[...], preferred_element_type=jnp.float32)
    out_ref[...] = _layernorm(rows, gamma_ref, beta_ref, eps, do_ln).astype(out_ref.dtype)


def _embed_ln_hbm_kernel(ids_ref, w_hbm, gamma_ref, beta_ref, out_ref,
                         rows_vmem, sem, *, eps, do_ln, tb, unroll):
    """HBM path: manual row-gather DMA, double-buffered across grid steps."""
    t = pl.program_id(0)
    n_steps = pl.num_programs(0)
    cur = t & 1
    nxt = (t + 1) & 1

    def issue_tile(tile_idx, slot):
        base = tile_idx * tb

        @pl.loop(0, tb // unroll)
        def _issue(g):
            r0 = pl.multiple_of(g * unroll, unroll)
            for u in range(unroll):     # static unroll: descriptors pushed back-to-back
                r = r0 + u
                tok = ids_ref[base + r]
                pltpu.make_async_copy(
                    w_hbm.at[pl.ds(tok, 1), :],
                    rows_vmem.at[slot, pl.ds(r, 1), :],
                    sem.at[slot],
                ).start()

    # Prime the pipeline: tile 0 -> slot 0 on the very first step.
    @pl.when(t == 0)
    def _prime():
        issue_tile(0, 0)

    # Prefetch the next tile's rows into the other slot; they land while this
    # tile's LayerNorm runs (ids for all tiles already sit in SMEM).
    @pl.when(t + 1 < n_steps)
    def _prefetch():
        issue_tile(t + 1, nxt)

    # Single slab-sized drain: DMA semaphores count bytes, so one (tb, H) wait
    # drains all tb row copies issued against sem[cur] (no tb serialized waits).
    pltpu.make_async_copy(
        w_hbm.at[pl.ds(0, tb), :],
        rows_vmem.at[cur],
        sem.at[cur],
    ).wait()

    rows = rows_vmem[cur].astype(jnp.float32)
    out_ref[...] = _layernorm(rows, gamma_ref, beta_ref, eps, do_ln).astype(out_ref.dtype)


def embedding_forward(input_ids, position_ids, weight, gamma, beta, *,
                      embed_layernorm=True, eps=1e-5, force_hbm_gather=False):
    """Bloom Embedding forward. position_ids accepted but unused (alibi)."""
    del position_ids  # alibi positional encoding: no position embedding added
    B, S = input_ids.shape
    V, H = weight.shape
    n_tok = B * S
    out_dtype = weight.dtype
    w_bytes = jnp.dtype(weight.dtype).itemsize
    o_bytes = jnp.dtype(out_dtype).itemsize

    # The torch module raises on oob ids; clamping keeps the data-dependent
    # gather in bounds for any caller (documented semantic difference).
    ids_flat = jnp.clip(input_ids.reshape(n_tok).astype(jnp.int32), 0, V - 1)

    # Generation-aware VMEM budgeting (128 MiB on v5e/v6e, 64 MiB on v7x).
    try:
        vmem_cap = int(getattr(pltpu.get_tpu_info(), "vmem_capacity_bytes", 64 * _MIB))
    except Exception:
        vmem_cap = 64 * _MIB            # conservative fallback (v7x size)
    vmem_limit = int(max(32 * _MIB, min(100 * _MIB, (vmem_cap * 72) // 100)))
    tb_cap = 256 if vmem_cap <= 64 * _MIB else 512          # smaller tiles on v7x

    table_bytes = V * H * w_bytes
    use_vmem_table = (not force_hbm_gather) and table_bytes <= 8 * _MIB and V <= 4096

    gamma2 = gamma.reshape(1, H).astype(jnp.float32)
    beta2 = beta.reshape(1, H).astype(jnp.float32)

    def pick_tb(per_tok, budget):
        tb = max(8, (int(budget) // max(int(per_tok), 1)) // 8 * 8)
        tb = min(tb, tb_cap, _round_up(n_tok, 8))
        # Keep >= 2 grid steps when there is enough work: keeps both v7x
        # TensorCores busy (fast path) and overlaps gather/compute (HBM path).
        half = _round_up((n_tok + 1) // 2, 8)
        if half >= 64:
            tb = min(tb, half)
        return int(max(8, tb))

    if use_vmem_table:
        # Per-token cost: iota + one-hot row (V) + f32 LN temp + 2x out tile (H).
        per_tok = V * (w_bytes + 4) + H * (4 + 2 * o_bytes)
        budget = max(_MIB, (vmem_limit * 45) // 100 - 2 * table_bytes)
        tb = pick_tb(per_tok, budget)
        n_pad = _round_up(n_tok, tb)
        ids_pad = jnp.pad(ids_flat, (0, n_pad - n_tok)) if n_pad != n_tok else ids_flat
        ids_2d = ids_pad.reshape(n_pad, 1)

        kernel = functools.partial(_embed_ln_vmem_kernel, eps=eps, do_ln=embed_layernorm)
        out_flat = pl.pallas_call(
            kernel,
            out_shape=jax.ShapeDtypeStruct((n_pad, H), out_dtype),
            grid=(n_pad // tb,),
            in_specs=[
                pl.BlockSpec((tb, 1), lambda t: (t, 0)),     # ids tile
                pl.BlockSpec((V, H), lambda t: (0, 0)),      # table resident in VMEM
                pl.BlockSpec((1, H), lambda t: (0, 0)),      # gamma (resident)
                pl.BlockSpec((1, H), lambda t: (0, 0)),      # beta  (resident)
            ],
            out_specs=pl.BlockSpec((tb, H), lambda t: (t, 0)),
            compiler_params=pltpu.CompilerParams(
                dimension_semantics=("parallel",),           # independent tiles -> megacore
                vmem_limit_bytes=vmem_limit,
            ),
        )(ids_2d, weight, gamma2, beta2)
    else:
        # Per-token cost: 2x gather slab + f32 LN temp + 2x output tile.
        per_tok = H * (2 * w_bytes + 4 + 2 * o_bytes)
        budget = (vmem_limit * 45) // 100
        tb = pick_tb(per_tok, budget)
        tb = min(tb, max(8, (V // 8) * 8))   # slab-wait descriptor must fit in (V, H)
        n_pad = _round_up(n_tok, tb)
        ids_pad = jnp.pad(ids_flat, (0, n_pad - n_tok)) if n_pad != n_tok else ids_flat
        # TODO(synk): pad rows of the final partial tile still gather row 0 and
        # run LN; predicating them is a minor win for very short sequences.

        kernel = functools.partial(_embed_ln_hbm_kernel, eps=eps,
                                   do_ln=embed_layernorm, tb=tb, unroll=8)
        grid_spec = pltpu.PrefetchScalarGridSpec(
            num_scalar_prefetch=1,
            grid=(n_pad // tb,),
            in_specs=[
                pl.BlockSpec(memory_space=pl.ANY),             # table stays in HBM
                pl.BlockSpec((1, H), lambda t, ids: (0, 0)),   # gamma (resident)
                pl.BlockSpec((1, H), lambda t, ids: (0, 0)),   # beta  (resident)
            ],
            out_specs=pl.BlockSpec((tb, H), lambda t, ids: (t, 0)),
            scratch_shapes=[
                pltpu.VMEM((2, tb, H), weight.dtype),          # double-buffered gather slab
                pltpu.SemaphoreType.DMA((2,)),                 # one DMA sem per slot
            ],
        )
        out_flat = pl.pallas_call(
            kernel,
            out_shape=jax.ShapeDtypeStruct((n_pad, H), out_dtype),
            grid_spec=grid_spec,
            compiler_params=pltpu.CompilerParams(
                # "arbitrary": the cross-step double-buffer carries scratch and
                # in-flight DMA state between grid steps, so the token axis
                # must run serially on one core.
                dimension_semantics=("arbitrary",),
                vmem_limit_bytes=vmem_limit,
            ),
        )(ids_pad, weight, gamma2, beta2)

    return out_flat[:n_tok].reshape(B, S, H)


def _reference_forward(input_ids, weight, gamma, beta, *, embed_layernorm=True, eps=1e-5):
    out = jnp.take(weight.astype(jnp.float32), input_ids, axis=0)
    if embed_layernorm:
        mean = jnp.mean(out, axis=-1, keepdims=True)
        var = jnp.mean((out - mean) ** 2, axis=-1, keepdims=True)
        out = (out - mean) * lax.rsqrt(var + eps)
        out = out * gamma + beta
    return out.astype(weight.dtype)


if __name__ == "__main__":
    # Small, Bloom-consistent synthetic shapes; n_tok=144 exercises multi-tile
    # grids, the pad-to-tile path, and both gather paths.
    B, S = 2, 72
    V, H = 512, 128   # padded_vocab_size, hidden_size

    key = jax.random.PRNGKey(0)
    k_w, k_ids = jax.random.split(key)

    # xavier_normal_ on a (V, H) table: std = sqrt(2 / (V + H)).
    xavier_std = (2.0 / (V + H)) ** 0.5
    weight = jax.random.normal(k_w, (V, H), dtype=jnp.float32) * xavier_std

    # LayerNorm(hidden_size) default params (gamma=1, beta=0).
    gamma = jnp.ones((H,), dtype=jnp.float32)
    beta = jnp.zeros((H,), dtype=jnp.float32)

    input_ids = jax.random.randint(k_ids, (B, S), 0, V, dtype=jnp.int32)
    position_ids = jnp.broadcast_to(jnp.arange(S, dtype=jnp.int32), (B, S))

    # Mirrors the torch.any(input_ >= num_embeddings) ValueError check.
    assert int(jnp.max(input_ids)) < V, "input id exceeds vocab size"

    ref = _reference_forward(input_ids, weight, gamma, beta)

    # Fast path (table resident in VMEM, one-hot MXU gather).
    out_fast = jax.block_until_ready(
        embedding_forward(input_ids, position_ids, weight, gamma, beta))
    assert out_fast.shape == (B, S, H)
    assert jnp.allclose(out_fast, ref, atol=1e-5, rtol=1e-5), "fast path mismatch"

    # HBM row-gather path (double-buffered manual DMA), forced for coverage.
    out_hbm = jax.block_until_ready(
        embedding_forward(input_ids, position_ids, weight, gamma, beta,
                          force_hbm_gather=True))
    assert out_hbm.shape == (B, S, H)
    assert jnp.allclose(out_hbm, ref, atol=1e-5, rtol=1e-5), "HBM path mismatch"

    print("KERNEL_OK")
</pallas_src>

<mosaic_0001>
module attributes {stable_mosaic.version = 11 : i64} {
  func.func @_embed_ln_vmem_kernel(%arg0: i32, %arg1: memref<72x1xi32, #tpu.memory_space<vmem>>, %arg2: memref<512x128xf32, #tpu.memory_space<vmem>>, %arg3: memref<1x128xf32, #tpu.memory_space<vmem>>, %arg4: memref<1x128xf32, #tpu.memory_space<vmem>>, %arg5: memref<72x128xf32, #tpu.memory_space<vmem>>) attributes {dimension_semantics = [#tpu.dimension_semantics<parallel>], iteration_bounds = array<i64: 2>, scalar_prefetch = 0 : i64, scratch_operands = 0 : i64, tpu.core_type = #tpu.core_type<tc>, window_params = [{transform_indices = @transform_0, window_bounds = array<i64: 72, 1>}, {pipeline_mode = #tpu.pipeline_mode<synchronous>, transform_indices = @transform_1, window_bounds = array<i64: 512, 128>}, {pipeline_mode = #tpu.pipeline_mode<synchronous>, transform_indices = @transform_2, window_bounds = array<i64: 1, 128>}, {pipeline_mode = #tpu.pipeline_mode<synchronous>, transform_indices = @transform_3, window_bounds = array<i64: 1, 128>}, {transform_indices = @transform_4, window_bounds = array<i64: 72, 128>}]} {
    %c0 = arith.constant 0 : index
    %c0_0 = arith.constant 0 : index
    %0 = vector.load %arg1[%c0, %c0_0] : memref<72x1xi32, #tpu.memory_space<vmem>>, vector<72x1xi32>
    %1 = tpu.iota {dimensions = array<i32: 1>} : vector<72x512xi32>
    %2 = vector.broadcast %0 : vector<72x1xi32> to vector<72x512xi32>
    %3 = arith.cmpi eq, %1, %2 : vector<72x512xi32>
    %4 = arith.extui %3 : vector<72x512xi1> to vector<72x512xi32>
    %5 = arith.sitofp %4 : vector<72x512xi32> to vector<72x512xf32>
    %c0_1 = arith.constant 0 : index
    %c0_2 = arith.constant 0 : index
    %6 = vector.load %arg2[%c0_1, %c0_2] : memref<512x128xf32, #tpu.memory_space<vmem>>, vector<512x128xf32>
    %cst = arith.constant dense<0.000000e+00> : vector<72x128xf32>
    %7 = tpu.matmul %5, %6, %cst {dimension_numbers = #tpu.dot_dimension_numbers<[1], [0], [0], [1], [0, 0, 1, 1], [], []>} : vector<72x512xf32>, vector<512x128xf32>, vector<72x128xf32> -> vector<72x128xf32>
    %cst_3 = arith.constant dense<0.000000e+00> : vector<72xf32>
    %8 = vector.multi_reduction <add>, %7, %cst_3 [1] : vector<72x128xf32> to vector<72xf32>
    %9 = vector.shape_cast %8 : vector<72xf32> to vector<72x1xf32>
    %cst_4 = arith.constant 1.280000e+02 : f32
    %10 = vector.broadcast %cst_4 : f32 to vector<72x1xf32>
    %11 = arith.divf %9, %10 : vector<72x1xf32>
    %12 = vector.broadcast %11 : vector<72x1xf32> to vector<72x128xf32>
    %13 = arith.subf %7, %12 : vector<72x128xf32>
    %14 = arith.mulf %13, %13 : vector<72x128xf32>
    %cst_5 = arith.constant dense<0.000000e+00> : vector<72xf32>
    %15 = vector.multi_reduction <add>, %14, %cst_5 [1] : vector<72x128xf32> to vector<72xf32>
    %16 = vector.shape_cast %15 : vector<72xf32> to vector<72x1xf32>
    %cst_6 = arith.constant 1.280000e+02 : f32
    %17 = vector.broadcast %cst_6 : f32 to vector<72x1xf32>
    %18 = arith.divf %16, %17 : vector<72x1xf32>
    %19 = vector.broadcast %11 : vector<72x1xf32> to vector<72x128xf32>
    %20 = arith.subf %7, %19 : vector<72x128xf32>
    %cst_7 = arith.constant 9.99999974E-6 : f32
    %21 = vector.broadcast %cst_7 : f32 to vector<72x1xf32>
    %22 = arith.addf %18, %21 : vector<72x1xf32>
    %23 = math.rsqrt %22 : vector<72x1xf32>
    %24 = vector.broadcast %23 : vector<72x1xf32> to vector<72x128xf32>
    %25 = arith.mulf %20, %24 : vector<72x128xf32>
    %c0_8 = arith.constant 0 : index
    %c0_9 = arith.constant 0 : index
    %26 = vector.load %arg3[%c0_8, %c0_9] : memref<1x128xf32, #tpu.memory_space<vmem>>, vector<1x128xf32>
    %27 = vector.broadcast %26 : vector<1x128xf32> to vector<72x128xf32>
    %28 = arith.mulf %25, %27 : vector<72x128xf32>
    %c0_10 = arith.constant 0 : index
    %c0_11 = arith.constant 0 : index
    %29 = vector.load %arg4[%c0_10, %c0_11] : memref<1x128xf32, #tpu.memory_space<vmem>>, vector<1x128xf32>
    %30 = vector.broadcast %29 : vector<1x128xf32> to vector<72x128xf32>
    %31 = arith.addf %28, %30 : vector<72x128xf32>
    %c0_12 = arith.constant 0 : index
    %c0_13 = arith.constant 0 : index
    %32 = vector.load %arg5[%c0_12, %c0_13] : memref<72x128xf32, #tpu.memory_space<vmem>>, vector<72x128xf32>
    tpu.vector_store %arg5[%c0_12, %c0_13], %31 {strides = array<i32>} : memref<72x128xf32, #tpu.memory_space<vmem>>, vector<72x128xf32>,
    return
  }
  func.func @transform_0(%arg0: i32) -> (i32, i32) {
    %c0_i32 = arith.constant 0 : i32
    %c0_i32_0 = arith.constant 0 : i32
    return %arg0, %c0_i32 : i32, i32
  }
  func.func @transform_1(%arg0: i32) -> (i32, i32) {
    %c0_i32 = arith.constant 0 : i32
    %c0_i32_0 = arith.constant 0 : i32
    %c0_i32_1 = arith.constant 0 : i32
    return %c0_i32, %c0_i32_0 : i32, i32
  }
  func.func @transform_2(%arg0: i32) -> (i32, i32) {
    %c0_i32 = arith.constant 0 : i32
    %c0_i32_0 = arith.constant 0 : i32
    %c0_i32_1 = arith.constant 0 : i32
    return %c0_i32, %c0_i32_0 : i32, i32
  }
  func.func @transform_3(%arg0: i32) -> (i32, i32) {
    %c0_i32 = arith.constant 0 : i32
    %c0_i32_0 = arith.constant 0 : i32
    %c0_i32_1 = arith.constant 0 : i32
    return %c0_i32, %c0_i32_0 : i32, i32
  }
  func.func @transform_4(%arg0: i32) -> (i32, i32) {
    %c0_i32 = arith.constant 0 : i32
    %c0_i32_0 = arith.constant 0 : i32
    return %arg0, %c0_i32 : i32, i32
  }
}

</mosaic_0001>

<bundles_post_ra>
// kernel: tpu_custom_call.1
= control target key start
LH: loop header
LB: loop body
LE: loop exit
PB: predicated region body
PF: predicated region fallthrough
CT: control target
= control target key end

     0   :  { %9 = vsyncpa [#allocation3], 0  ;;  %s1668_s0 = inlined_call_operand.vmem [shape: s32[144,1], index: 0, kind: input, shape index: {}]   ;;  %s1669_s1 = inlined_call_operand.hbm [shape: f32[512,128], index: 1, kind: input, shape index: {}]   ;;  %s1670_s2 = inlined_call_operand.vmem [shape: f32[1,128], index: 2, kind: input, shape index: {}]   ;;  %s1671_s3 = inlined_call_operand.vmem [shape: f32[1,128], index: 3, kind: input, shape index: {}]   ;;  %s1672_s4 = inlined_call_operand.hbm [shape: f32[144,128], index: 4, kind: output, shape index: {}]  }
   0x1   :  { %10 = vsyncpa [#allocation4], 0 }
   0x2   :  { %12 = vsyncpa [#allocation4 + $0x1], 0  ;;  %s1349_s15 = smov 0   ;;  %s1351_s16 = smov 0  }
   0x3   :  { %s1353_s17 = smov 0   ;;  %s1355_s18 = smov 0  }
   0x4 LB: > { %s1370_s19 = sadd.s32 4294967295, %s1314_s18   ;;  %s876_s20 = sadd.s32 4294967294, %s1314_s18   ;;  %s1314_s18 = sphi %s1355_s18, %s1688_s18   ;;  %s1310_s17 = sphi %s1353_s17, %s1687_s17   ;;  %s1306_s16 = sphi %s1351_s16, %s1686_s16   ;;  %s1302_s15 = sphi %s1349_s15, %s1685_s15  }
   0x5   : > { %s1374_s21 = sadd.s32 1, %s1314_s18   ;;  %s114_s22 = sadd.s32 1, %s1310_s17 }
   0x6   : > { %s111_s23 = ssub.s32 %s1314_s18, %s1374_s21  ;;  %p124_p0 = scmp.ne.s32.totalorder %s1310_s17, %s1306_s16 }
   0x7   : > { %p112_p1 = scmp.eq.s32.totalorder %s111_s23, 0  ;;  %p125_p2 = scmp.eq.s32.totalorder %s1370_s19, 1 }
   0x8   : > { %p130_p3 = scmp.ne.s32.totalorder %s1306_s16, %s1302_s15  ;;  %p131_p4 = scmp.eq.s32.totalorder %s876_s20, 1 }
   0x9   : > { %s1385_s24 = scalar_select %p112_p1, %s1310_s17, %s114_s22  }
   0xa   : > { %p1387_p5 = por %p125_p2, %p124_p0  ;;  %p1391_p6 = por %p131_p4, %p130_p3 }
   0xb   : > { %p877_p7 = scmp.ge.s32.totalorder %s1314_s18, 1  ;;  %p138_p8 = scmp.lt.s32.totalorder %s1314_s18, 3 }
   0xc   : > { %s1676_s25 = scalar_select %p1387_p5, 1, 0 }
   0xd   : > { %s1677_s26 = scalar_select %p1391_p6, 1, 0 }
   0xe   : > { %p1673_p9 = scmp.eq.s32.totalorder %s1370_s19, 0  ;;  %p1398_p10 = pnand %p877_p7, %p138_p8 }
   0xf   : > { %s1316_s28 = smov [#allocation2]   ;;  %s1220_s7 = scalar_lea.hbm %s1669_s1, 8192 }
  0x10   : > { %s1678_s27 = scalar_select %p1398_p10, 1, 0 }
  0x11   : > { %s150_s29 = sshll.u32 %s1316_s28, 4  ;;  %p1150_p11 = pneg %p1398_p10  ;;  %s151_s29 = int_to_ptr.vmem [resolvable:$true] %s150_s29 }
  0x12   : > { %p1221_p13 = scmp.ne.s32.totalorder %s1669_s1, %s1220_s7  ;;  %p1227_p3 = scmp.lt.u32.totalorder %s1220_s7, %s1669_s1 }
  0x13   : > { %p1406_p12 = pnand %p1673_p9, %p1150_p11 }
  0x15   : > { %p1222_p0 = pneg %p1406_p12 }
  0x17   : > { %p1223_p1 = pnand %p1222_p0, %p1221_p13 }
  0x19   : > { %p1224_p2 = pneg %p1223_p1 }
  0x1b   : > { %p1229_p4 = pnand %p1227_p3, %p1224_p2 }
  0x1d   : > { %1232 = shalt.err (!%p1229_p4)
}
  0x1e   : > { %s1233_s12 = scalar_lea.vmem %s151_s29, 8192  ;;  %p1241_p9 = scmp.lt.s32.totalorder %s151_s29, %s151_s29 }
  0x1f   : > { %p1234_p7 = scmp.ne.s32.totalorder %s151_s29, %s1233_s12  ;;  %p1242_p6 = scmp.lt.s32.totalorder %s1233_s12, %s1233_s12 }
  0x21   : > { %p1236_p8 = pnand %p1234_p7, %p1222_p0  ;;  %p1243_p5 = por %p1242_p6, %p1241_p9 }
  0x23   : > { %p1237_p11 = pneg %p1236_p8 }
  0x25   : > { %p1244_p10 = pnand %p1243_p5, %p1237_p11 }
  0x27   : > { %1247 = shalt.err (!%p1244_p10)
}
  0x28   : > { %s1317_s13 = smov 128   ;;  %s1318_s14 = smov 8  }
  0x29   : > { %1153 = dma.hbm_to_vmem [thread:$0]  (!%p1406_p12), %s1669_s1, 8192, %s151_s29, [#allocation3], %s1317_s13, %s1317_s13, %s1318_s14  }
  0x2a   : > { %p1680_p13 = scmp.ne.s32.totalorder %s1678_s27, 0 }
  0x2b   : > { %p1681_p1 = scmp.eq.s32.totalorder (!%p1680_p13), %s1370_s19, 0 }
  0x2c   : > { %181 = sbr.rel (%p1680_p13) target bundleno = 765 (0x2fd), region = 36 }
  0x33   : > { %1293 = dma.done.wait (%p1681_p1), [#allocation3], 8192   ;;  %p1682_p0 = pmov %p1681_p1 }
  0x34   : > { %s207_s23 = smul.u32 9, %s1370_s19  ;;  %v1319_v0 = vmov 0   ;;  %v379_v1 = vld [vmem:[#allocation2 + $0x80] sm:$0xff]  ;;  %v380_v2 = vld [vmem:[#allocation2 + $0x88] sm:$0xff]  ;;  %v381_v18 = vld [vmem:[#allocation2 + $0x90] sm:$0xff]  ;;  %s204_s27 = sand.u32 1, %s1306_s16  }
  0x35   : > { %1295 = vsyncadd (%p1682_p0), [#allocation3], 4294959104  ;;  %1201 = vset.pattern.permute.xlu1 %v1319_v0  ;;  %1200 = vset.pattern.permute.xlu0 %v1319_v0  ;;  %v1079_v5 = vpack.c.bf16 %v380_v2, %v379_v1  ;;  %v411_v6 = vld [vmem:[#allocation2 + $0x180] sm:$0xff]  ;;  %v412_v9 = vld [vmem:[#allocation2 + $0x188] sm:$0xff]  ;;  %s1143_s6 = smul.u32 72, %s204_s27  ;;  %p1683_p9 = scmp.ne.s32.totalorder %s1676_s25, 0 }
  0x36   : > { %p208_p5 = scmp.lt.s32.totalorder %s207_s23, 17  ;;  %v363_v10 = vld [vmem:[#allocation2] sm:$0xff]  ;;  %v364_v11 = vld [vmem:[#allocation2 + $0x8] sm:$0xff]  ;;  %v1111_v14 = vpack.c.bf16 %v412_v9, %v411_v6  ;;  %v382_v20 = vld [vmem:[#allocation2 + $0x98] sm:$0xff]  ;;  %s960_s12 = smul.u32 1152, %s1370_s19 }
  0x37   : > { %1080 = vmatprep.subr.bf16.mxu0 %v1079_v5  ;;  %v1081_v15 = vpack.c.bf16 %v364_v11, %v363_v10  ;;  %v395_v16 = vld [vmem:[#allocation2 + $0x100] sm:$0xff]  ;;  %v396_v17 = vld [vmem:[#allocation2 + $0x108] sm:$0xff]  ;;  %v413_v21 = vld [vmem:[#allocation2 + $0x190] sm:$0xff]  ;;  %v1083_v23 = vpack.c.bf16 %v382_v20, %v381_v18  ;;  %s1582_s11 = scalar_lea.vmem [#allocation5], %s1143_s6  ;;  %s1627_s19 = scalar_lea.sflag [#allocation4], %s204_s27 }
  0x38   : > { %s1690_s23 = smov (!%p208_p5, %s207_s23), 17  ;;  %v1113_v19 = vpack.c.bf16 %v396_v17, %v395_v16  ;;  %v414_v22 = vld [vmem:[#allocation2 + $0x198] sm:$0xff]  ;;  %1112 = vmatprep.subr.bf16.mxu1 %v1111_v14  ;;  %v365_v25 = vld [vmem:[#allocation2 + $0x10] sm:$0xff]  ;;  %v383_v30 = vld [vmem:[#allocation2 + $0xa0] sm:$0xff]  ;;  %s802_s13 = sshll.u32 %s1582_s11, 4  ;;  %s1622_s13 = int_to_ptr.vmem [resolvable:$true] %s802_s13 }
  0x39   : > { %s882_s28 = sshll.u32 %s1690_s23, 3  ;;  %1082 = vmatpush3.bf16.msra.mxu0 %v1081_v15  ;;  %v1115_v24 = vpack.c.bf16 %v414_v22, %v413_v21  ;;  %v366_v26 = vld [vmem:[#allocation2 + $0x18] sm:$0xff]  ;;  %v397_v27 = vld [vmem:[#allocation2 + $0x110] sm:$0xff]  ;;  %v384_v31 = vld [vmem:[#allocation2 + $0xa8] sm:$0xff]  ;;  %s1619_s22 = scalar_lea.hbm %s1672_s4, %s960_s12 }
  0x3a   : > { %s1436_s29 = scalar_lea.vmem %s1668_s0, %s882_s28  ;;  %1114 = vmatpush3.bf16.msra.mxu1 %v1113_v19  ;;  %v1085_v28 = vpack.c.bf16 %v366_v26, %v365_v25  ;;  %v398_v29 = vld [vmem:[#allocation2 + $0x118] sm:$0xff]  ;;  %1084 = vmatprep.subr.bf16.mxu0 %v1083_v23  ;;  %v1087_v35 = vpack.c.bf16 %v384_v31, %v383_v30  ;;  %v415_v36 = vld [vmem:[#allocation2 + $0x1a0] sm:$0xff]  ;;  %v416_v37 = vld [vmem:[#allocation2 + $0x1a8] sm:$0xff]  ;;  %s1248_s23 = scalar_lea.vmem %s1622_s13, 1152 }
  0x3b   : > { %v216_v3 = vld [vmem:[%s1436_s29 + $0x10] sm:$0xff]  ;;  %v214_v4 = vld [vmem:[%s1436_s29] sm:$0xff]  ;;  %v217_v7 = vld [vmem:[%s1436_s29 + $0x18] sm:$0xff]  ;;  %1116 = vmatprep.subr.bf16.mxu1 %v1115_v24  ;;  %v1117_v34 = vpack.c.bf16 %v398_v29, %v397_v27  ;;  %v1119_v39 = vpack.c.bf16 %v416_v37, %v415_v36  ;;  %p1249_p6 = scmp.ne.s32.totalorder %s1622_s13, %s1248_s23  ;;  %s1321_s28 = smov [#allocation5]  }
  0x3c   : > { %235 = vperm.xlu1 %1201, %v216_v3   ;;  %229 = vperm.xlu0 %1200, %v214_v4   ;;  %v215_v8 = vld [vmem:[%s1436_s29 + $0x8] sm:$0xff]  ;;  %v218_v13 = vld [vmem:[%s1436_s29 + $0x20] sm:$0xff]  ;;  %v221_v32 = vld [vmem:[%s1436_s29 + $0x38] sm:$0xff]  ;;  %s1252_s30 = sshll.u32 %s1321_s28, 4  ;;  %s1253_s30 = int_to_ptr.vmem [resolvable:$false] %s1252_s30 }
  0x3d   : > { %v219_v12 = vld [vmem:[%s1436_s29 + $0x28] sm:$0xff]  ;;  %v220_v33 = vld [vmem:[%s1436_s29 + $0x30] sm:$0xff]  ;;  %v368_v40 = vld [vmem:[#allocation2 + $0x28] sm:$0xff]  ;;  %1086 = vmatpush3.bf16.msra.mxu0 %v1085_v28  ;;  %p1250_p10 = pnand %p1249_p6, %p1683_p9  ;;  %s1254_s5 = scalar_lea.vmem %s1253_s30, 2304 }
  0x3e   : > { %v367_v38 = vld [vmem:[#allocation2 + $0x20] sm:$0xff]  ;;  %v400_v42 = vld [vmem:[#allocation2 + $0x128] sm:$0xff]  ;;  %v385_v44 = vld [vmem:[#allocation2 + $0xb0] sm:$0xff]  ;;  %1118 = vmatpush3.bf16.msra.mxu1 %v1117_v34  ;;  %1088 = vmatprep.subr.bf16.mxu0 %v1087_v35  ;;  %p1255_p2 = scmp.lt.s32.totalorder %s1622_s13, %s1253_s30  ;;  %p1256_p3 = scmp.lt.s32.totalorder %s1254_s5, %s1248_s23 }
  0x3f   : > { %v399_v41 = vld [vmem:[#allocation2 + $0x120] sm:$0xff]  ;;  %v1089_v43 = vpack.c.bf16 %v368_v40, %v367_v38  ;;  %v386_v45 = vld [vmem:[#allocation2 + $0xb8] sm:$0xff]  ;;  %v417_v46 = vld [vmem:[#allocation2 + $0x1b0] sm:$0xff]  ;;  %1120 = vmatprep.subr.bf16.mxu1 %v1119_v39  ;;  %p1251_p12 = pneg %p1250_p10 }
  0x40   : > { %238 = vperm.xlu1 %1201, %v217_v7   ;;  %232 = vperm.xlu0 %1200, %v215_v8   ;;  %v1121_v47 = vpack.c.bf16 %v400_v42, %v399_v41  ;;  %v1091_v48 = vpack.c.bf16 %v386_v45, %v385_v44  ;;  %v418_v49 = vld [vmem:[#allocation2 + $0x1b8] sm:$0xff]  ;;  %v369_v50 = vld [vmem:[#allocation2 + $0x30] sm:$0xff]  ;;  %v387_v55 = vld [vmem:[#allocation2 + $0xc0] sm:$0xff]  ;;  %v223_v42 = vlaneseq  ;;  %p1257_p4 = por %p1256_p3, %p1255_p2 }
  0x41   : > { %v370_v51 = vld [vmem:[#allocation2 + $0x38] sm:$0xff]  ;;  %v1123_v52 = vpack.c.bf16 %v418_v49, %v417_v46  ;;  %v401_v53 = vld [vmem:[#allocation2 + $0x130] sm:$0xff]  ;;  %v388_v56 = vld [vmem:[#allocation2 + $0xc8] sm:$0xff]  ;;  %1090 = vmatpush3.bf16.msra.mxu0 %v1089_v43 }
  0x42   : > { %v402_v54 = vld [vmem:[#allocation2 + $0x138] sm:$0xff]  ;;  %v419_v57 = vld [vmem:[#allocation2 + $0x1c0] sm:$0xff]  ;;  %v420_v58 = vld [vmem:[#allocation2 + $0x1c8] sm:$0xff]  ;;  %v1093_v60 = vpack.c.bf16 %v370_v51, %v369_v50  ;;  %1122 = vmatpush3.bf16.msra.mxu1 %v1121_v47  ;;  %1092 = vmatprep.subr.bf16.mxu0 %v1091_v48  ;;  %v1095_v62 = vpack.c.bf16 %v388_v56, %v387_v55  ;;  %v1447_v43 = vand.u32 127, %v223_v42  ;;  %v1320_v48 = vmov 1.0   ;;  %p1258_p7 = pnand %p1257_p4, %p1251_p12 }
  0x43   : > { %v222_v59 = vld [vmem:[%s1436_s29 + $0x40] sm:$0xff]  ;;  %v1125_v61 = vpack.c.bf16 %v402_v54, %v401_v53  ;;  %v371_v63 = vld [vmem:[#allocation2 + $0x40] sm:$0xff]  ;;  %v372_v0 = vld [vmem:[#allocation2 + $0x48] sm:$0xff]  ;;  %1124 = vmatprep.subr.bf16.mxu1 %v1123_v52  ;;  %v1127_v2 = vpack.c.bf16 %v420_v58, %v419_v57 }
  0x44   : > { %244 = vperm.xlu1 %1201, %v219_v12   ;;  %241 = vperm.xlu0 %1200, %v218_v13   ;;  %v403_v1 = vld [vmem:[#allocation2 + $0x140] sm:$0xff]  ;;  %v404_v3 = vld [vmem:[#allocation2 + $0x148] sm:$0xff]  ;;  %v389_v4 = vld [vmem:[#allocation2 + $0xd0] sm:$0xff]  ;;  %v1097_v8 = vpack.c.bf16 %v372_v0, %v371_v63  ;;  %v1450_v44 = vadd.s32 128, %v1447_v43  ;;  %v1453_v45 = vadd.s32 384, %v1447_v43  ;;  %v1456_v46 = vadd.s32 256, %v1447_v43 }
  0x45   : > { %v390_v5 = vld [vmem:[#allocation2 + $0xd8] sm:$0xff]  ;;  %v421_v6 = vld [vmem:[#allocation2 + $0x1d0] sm:$0xff]  ;;  %1094 = vmatpush3.bf16.msra.mxu0 %v1093_v60  ;;  %v1129_v9 = vpack.c.bf16 %v404_v3, %v403_v1  ;;  %v391_v16 = vld [vmem:[#allocation2 + $0xe0] sm:$0xff] }
  0x46   : > { %v422_v7 = vld [vmem:[#allocation2 + $0x1d8] sm:$0xff]  ;;  %1126 = vmatpush3.bf16.msra.mxu1 %v1125_v61  ;;  %1096 = vmatprep.subr.bf16.mxu0 %v1095_v62  ;;  %v1099_v10 = vpack.c.bf16 %v390_v5, %v389_v4  ;;  %v373_v11 = vld [vmem:[#allocation2 + $0x50] sm:$0xff]  ;;  %v392_v17 = vld [vmem:[#allocation2 + $0xe8] sm:$0xff] }
  0x47   : > { %v374_v12 = vld [vmem:[#allocation2 + $0x58] sm:$0xff]  ;;  %v405_v13 = vld [vmem:[#allocation2 + $0x150] sm:$0xff]  ;;  %1128 = vmatprep.subr.bf16.mxu1 %v1127_v2  ;;  %v1131_v14 = vpack.c.bf16 %v422_v7, %v421_v6  ;;  %v423_v18 = vld [vmem:[#allocation2 + $0x1e0] sm:$0xff]  ;;  %v1103_v22 = vpack.c.bf16 %v392_v17, %v391_v16 }
  0x48   : > { %250 = vperm.xlu1 %1201, %v221_v32   ;;  %247 = vperm.xlu0 %1200, %v220_v33   ;;  %v406_v15 = vld [vmem:[#allocation2 + $0x158] sm:$0xff]  ;;  %v424_v19 = vld [vmem:[#allocation2 + $0x1e8] sm:$0xff]  ;;  %v1101_v20 = vpack.c.bf16 %v374_v12, %v373_v11  ;;  %v375_v23 = vld [vmem:[#allocation2 + $0x60] sm:$0xff] }
  0x49   : > { %1098 = vmatpush3.bf16.msra.mxu0 %v1097_v8  ;;  %v1133_v21 = vpack.c.bf16 %v406_v15, %v405_v13  ;;  %v376_v24 = vld [vmem:[#allocation2 + $0x68] sm:$0xff]  ;;  %v407_v25 = vld [vmem:[#allocation2 + $0x160] sm:$0xff]  ;;  %v1135_v26 = vpack.c.bf16 %v424_v19, %v423_v18  ;;  %v393_v28 = vld [vmem:[#allocation2 + $0xf0] sm:$0xff] }
  0x4a   : > { %1130 = vmatpush3.bf16.msra.mxu1 %v1129_v9  ;;  %1100 = vmatprep.subr.bf16.mxu0 %v1099_v10  ;;  %v408_v27 = vld [vmem:[#allocation2 + $0x168] sm:$0xff]  ;;  %v394_v29 = vld [vmem:[#allocation2 + $0xf8] sm:$0xff]  ;;  %v425_v30 = vld [vmem:[#allocation2 + $0x1f0] sm:$0xff]  ;;  %v1105_v32 = vpack.c.bf16 %v376_v24, %v375_v23 }
  0x4b   : > { %1132 = vmatprep.subr.bf16.mxu1 %v1131_v14  ;;  %v426_v31 = vld [vmem:[#allocation2 + $0x1f8] sm:$0xff]  ;;  %v1137_v33 = vpack.c.bf16 %v408_v27, %v407_v25  ;;  %v1107_v34 = vpack.c.bf16 %v394_v29, %v393_v28  ;;  %v377_v35 = vld [vmem:[#allocation2 + $0x70] sm:$0xff] }
  0x4c   : > { %253 = vperm.xlu0 %1200, %v222_v59   ;;  %v378_v36 = vld [vmem:[#allocation2 + $0x78] sm:$0xff]  ;;  %v1139_v37 = vpack.c.bf16 %v426_v31, %v425_v30  ;;  %v409_v38 = vld [vmem:[#allocation2 + $0x170] sm:$0xff] }
  0x4d   : > { %1102 = vmatpush3.bf16.msra.mxu0 %v1101_v20  ;;  %v410_v39 = vld [vmem:[#allocation2 + $0x178] sm:$0xff]  ;;  %v1109_v40 = vpack.c.bf16 %v378_v36, %v377_v35 }
  0x4e   : > { %1134 = vmatpush3.bf16.msra.mxu1 %v1133_v21  ;;  %1104 = vmatprep.subr.bf16.mxu0 %v1103_v22  ;;  %v1141_v41 = vpack.c.bf16 %v410_v39, %v409_v38 }
  0x4f   : > { %1136 = vmatprep.subr.bf16.mxu1 %v1135_v26 }
  0x51   : > { %1106 = vmatpush3.bf16.msra.mxu0 %v1105_v32 }
  0x52   : > { %1138 = vmatpush3.bf16.msra.mxu1 %v1137_v33  ;;  %1108 = vmatprep.subr.bf16.mxu0 %v1107_v34 }
  0x53   : > { %1140 = vmatprep.subr.bf16.mxu1 %v1139_v37 }
  0x55   : > { %1110 = vmatpush3.bf16.msra.mxu0 %v1109_v40 }
  0x56   : > { %1142 = vmatpush3.bf16.msra.mxu1 %v1141_v41 }
  0xbb   : > { %v230_v47 = vpop.permute.xlu0 %229  ;;  %v236_v49 = vpop.permute.xlu1 %235 }
  0xbc   : > { %vm256_vm0 = vcmp.eq.s32.totalorder %v1450_v44, %v230_v47  ;;  %vm258_vm1 = vcmp.eq.s32.totalorder %v1453_v45, %v230_v47  ;;  %vm255_vm2 = vcmp.eq.s32.totalorder %v1447_v43, %v230_v47  ;;  %vm257_vm3 = vcmp.eq.s32.totalorder %v1456_v46, %v230_v47 }
  0xbd   : > { %919 = vmatprep.mubr.msk.f32.mxu0 %vm256_vm0, %v1320_v48  ;;  %937 = vmatprep.mubr.msk.f32.mxu1 %vm258_vm1, %v1320_v48  ;;  %vm264_vm4 = vcmp.eq.s32.totalorder %v1450_v44, %v236_v49  ;;  %vm266_vm5 = vcmp.eq.s32.totalorder %v1453_v45, %v236_v49  ;;  %vm263_vm10 = vcmp.eq.s32.totalorder %v1447_v43, %v236_v49 }
  0xbe   : > { %920 = vmatmul.mubr.msk.f32.vlgmr.msra.gmra.mrb[0].mxu0 %vm255_vm2, %v1320_v48  ;;  %938 = vmatmul.mubr.msk.f32.vlgmr.msra.gmra.mrb[0].mxu1 %vm257_vm3, %v1320_v48  ;;  %vm265_vm11 = vcmp.eq.s32.totalorder %v1456_v46, %v236_v49 }
  0xbf   : > { %v233_v50 = vpop.permute.xlu0 %232  ;;  %v239_v51 = vpop.permute.xlu1 %238 }
  0xc0   : > { %vm260_vm6 = vcmp.eq.s32.totalorder %v1450_v44, %v233_v50  ;;  %vm262_vm7 = vcmp.eq.s32.totalorder %v1453_v45, %v233_v50  ;;  %vm259_vm8 = vcmp.eq.s32.totalorder %v1447_v43, %v233_v50  ;;  %vm261_vm9 = vcmp.eq.s32.totalorder %v1456_v46, %v233_v50 }
  0xc1   : > { %921 = vmatprep.mubr.msk.f32.mxu0 %vm260_vm6, %v1320_v48  ;;  %939 = vmatprep.mubr.msk.f32.mxu1 %vm262_vm7, %v1320_v48  ;;  %vm268_vm12 = vcmp.eq.s32.totalorder %v1450_v44, %v239_v51  ;;  %vm270_vm13 = vcmp.eq.s32.totalorder %v1453_v45, %v239_v51  ;;  %vm267_vm14 = vcmp.eq.s32.totalorder %v1447_v43, %v239_v51 }
  0xc2   : > { %922 = vmatmul.mubr.msk.f32.gmra.mrb[2].mxu0 %vm259_vm8, %v1320_v48  ;;  %940 = vmatmul.mubr.msk.f32.gmra.mrb[2].mxu1 %vm261_vm9, %v1320_v48  ;;  %vm269_vm15 = vcmp.eq.s32.totalorder %v1456_v46, %v239_v51 }
  0xc3   : > { %923 = vmatprep.mubr.msk.f32.mxu0 %vm264_vm4, %v1320_v48  ;;  %941 = vmatprep.mubr.msk.f32.mxu1 %vm266_vm5, %v1320_v48  ;;  %v242_v52 = vpop.permute.xlu0 %241  ;;  %v245_v53 = vpop.permute.xlu1 %244 }
  0xc4   : > { %vm272_vm0 = vcmp.eq.s32.totalorder %v1450_v44, %v242_v52  ;;  %vm274_vm1 = vcmp.eq.s32.totalorder %v1453_v45, %v242_v52  ;;  %vm271_vm2 = vcmp.eq.s32.totalorder %v1447_v43, %v242_v52  ;;  %vm273_vm3 = vcmp.eq.s32.totalorder %v1456_v46, %v242_v52 }
  0xc5   : > { %vm276_vm4 = vcmp.eq.s32.totalorder %v1450_v44, %v245_v53  ;;  %vm278_vm5 = vcmp.eq.s32.totalorder %v1453_v45, %v245_v53  ;;  %vm275_vm6 = vcmp.eq.s32.totalorder %v1447_v43, %v245_v53  ;;  %vm277_vm7 = vcmp.eq.s32.totalorder %v1456_v46, %v245_v53 }
  0xc6   : > { %924 = vmatmul.mubr.msk.f32.gmra.mrb[4].mxu0 %vm263_vm10, %v1320_v48  ;;  %942 = vmatmul.mubr.msk.f32.gmra.mrb[4].mxu1 %vm265_vm11, %v1320_v48 }
  0xc7   : > { %925 = vmatprep.mubr.msk.f32.mxu0 %vm268_vm12, %v1320_v48  ;;  %943 = vmatprep.mubr.msk.f32.mxu1 %vm270_vm13, %v1320_v48  ;;  %v248_v54 = vpop.permute.xlu0 %247  ;;  %v251_v55 = vpop.permute.xlu1 %250 }
  0xc8   : > { %vm280_vm8 = vcmp.eq.s32.totalorder %v1450_v44, %v248_v54  ;;  %vm282_vm9 = vcmp.eq.s32.totalorder %v1453_v45, %v248_v54  ;;  %vm279_vm10 = vcmp.eq.s32.totalorder %v1447_v43, %v248_v54  ;;  %vm281_vm11 = vcmp.eq.s32.totalorder %v1456_v46, %v248_v54 }
  0xc9   : > { %vm284_vm12 = vcmp.eq.s32.totalorder %v1450_v44, %v251_v55  ;;  %vm286_vm13 = vcmp.eq.s32.totalorder %v1453_v45, %v251_v55 }
  0xca   : > { %926 = vmatmul.mubr.msk.f32.gmra.mrb[6].mxu0 %vm267_vm14, %v1320_v48  ;;  %944 = vmatmul.mubr.msk.f32.gmra.mrb[6].mxu1 %vm269_vm15, %v1320_v48  ;;  %vm283_vm14 = vcmp.eq.s32.totalorder %v1447_v43, %v251_v55  ;;  %vm285_vm15 = vcmp.eq.s32.totalorder %v1456_v46, %v251_v55 }
  0xcb   : > { %927 = vmatprep.mubr.msk.f32.mxu0 %vm272_vm0, %v1320_v48  ;;  %945 = vmatprep.mubr.msk.f32.mxu1 %vm274_vm1, %v1320_v48  ;;  %v254_v56 = vpop.permute.xlu0 %253 }
  0xcc   : > { %vm288_vm0 = vcmp.eq.s32.totalorder %v1450_v44, %v254_v56  ;;  %vm290_vm1 = vcmp.eq.s32.totalorder %v1453_v45, %v254_v56 }
  0xce   : > { %928 = vmatmul.mubr.msk.f32.gmra.mrb[8].mxu0 %vm271_vm2, %v1320_v48  ;;  %946 = vmatmul.mubr.msk.f32.gmra.mrb[8].mxu1 %vm273_vm3, %v1320_v48  ;;  %vm287_vm2 = vcmp.eq.s32.totalorder %v1447_v43, %v254_v56  ;;  %vm289_vm3 = vcmp.eq.s32.totalorder %v1456_v46, %v254_v56 }
  0xcf   : > { %929 = vmatprep.mubr.msk.f32.mxu0 %vm276_vm4, %v1320_v48  ;;  %947 = vmatprep.mubr.msk.f32.mxu1 %vm278_vm5, %v1320_v48 }
  0xd2   : > { %930 = vmatmul.mubr.msk.f32.gmra.mrb[10].mxu0 %vm275_vm6, %v1320_v48  ;;  %948 = vmatmul.mubr.msk.f32.gmra.mrb[10].mxu1 %vm277_vm7, %v1320_v48 }
  0xd3   : > { %931 = vmatprep.mubr.msk.f32.mxu0 %vm280_vm8, %v1320_v48  ;;  %949 = vmatprep.mubr.msk.f32.mxu1 %vm282_vm9, %v1320_v48 }
  0xd6   : > { %932 = vmatmul.mubr.msk.f32.gmra.mrb[12].mxu0 %vm279_vm10, %v1320_v48  ;;  %950 = vmatmul.mubr.msk.f32.gmra.mrb[12].mxu1 %vm281_vm11, %v1320_v48 }
  0xd7   : > { %933 = vmatprep.mubr.msk.f32.mxu0 %vm284_vm12, %v1320_v48  ;;  %951 = vmatprep.mubr.msk.f32.mxu1 %vm286_vm13, %v1320_v48 }
  0xda   : > { %934 = vmatmul.mubr.msk.f32.gmra.mrb[14].mxu0 %vm283_vm14, %v1320_v48  ;;  %952 = vmatmul.mubr.msk.f32.gmra.mrb[14].mxu1 %vm285_vm15, %v1320_v48 }
  0xdb   : > { %935 = vmatprep.mubr.msk.f32.mxu0 %vm288_vm0, %v1320_v48  ;;  %953 = vmatprep.mubr.msk.f32.mxu1 %vm290_vm1, %v1320_v48 }
  0xde   : > { %936 = vmatmul.mubr.msk.f32.gmra.mrb[16].mxu0 %vm287_vm2, %v1320_v48  ;;  %954 = vmatmul.mubr.msk.f32.gmra.mrb[16].mxu1 %vm289_vm3, %v1320_v48 }
 0x191   : > { %v993_v57 = vpop.f32.mrb[0].mxu0  ;;  %v1052_v58 = vpop.f32.mrb[0].mxu1 }
 0x192   : > { %v994_v59 = vpop.f32.mrb[1].mxu0  ;;  %v1053_v60 = vpop.f32.mrb[1].mxu1 }
 0x193   : > { %v995_v61 = vadd.f32 %v994_v59, %v993_v57  ;;  %v1054_v62 = vadd.f32 %v1053_v60, %v1052_v58 }
 0x195   : > { %v996_v63 = vpop.f32.mrb[2].mxu0  ;;  %v1055_v0 = vpop.f32.mrb[2].mxu1  ;;  %v1530_v1 = vadd.f32 %v1054_v62, %v995_v61 }
 0x196   : > { %v997_v2 = vpop.f32.mrb[3].mxu0  ;;  %v1056_v3 = vpop.f32.mrb[3].mxu1 }
 0x197   : > { %v998_v4 = vadd.f32 %v997_v2, %v996_v63  ;;  %v1057_v5 = vadd.f32 %v1056_v3, %v1055_v0  ;;  %647 = vadd.xlane.f32.xlu1 %v1530_v1 }
 0x199   : > { %v999_v6 = vpop.f32.mrb[4].mxu0  ;;  %v1058_v7 = vpop.f32.mrb[4].mxu1  ;;  %v609_v8 = vadd.f32 %v1057_v5, %v998_v4 }
 0x19a   : > { %v1000_v9 = vpop.f32.mrb[5].mxu0  ;;  %v1059_v10 = vpop.f32.mrb[5].mxu1 }
 0x19b   : > { %v1001_v11 = vadd.f32 %v1000_v9, %v999_v6  ;;  %v1060_v12 = vadd.f32 %v1059_v10, %v1058_v7  ;;  %649 = vadd.xlane.f32.xlu0 %v609_v8 }
 0x19d   : > { %v1002_v13 = vpop.f32.mrb[6].mxu0  ;;  %v1061_v14 = vpop.f32.mrb[6].mxu1  ;;  %v614_v15 = vadd.f32 %v1060_v12, %v1001_v11 }
 0x19e   : > { %v1003_v16 = vpop.f32.mrb[7].mxu0  ;;  %v1062_v17 = vpop.f32.mrb[7].mxu1 }
 0x19f   : > { %v1004_v18 = vadd.f32 %v1003_v16, %v1002_v13  ;;  %v1063_v19 = vadd.f32 %v1062_v17, %v1061_v14  ;;  %651 = vadd.xlane.f32.xlu0 %v614_v15 }
 0x1a1   : > { %v1005_v20 = vpop.f32.mrb[8].mxu0  ;;  %v1064_v21 = vpop.f32.mrb[8].mxu1  ;;  %v619_v22 = vadd.f32 %v1063_v19, %v1004_v18 }
 0x1a2   : > { %v1006_v23 = vpop.f32.mrb[9].mxu0  ;;  %v1065_v24 = vpop.f32.mrb[9].mxu1 }
 0x1a3   : > { %v1007_v25 = vadd.f32 %v1006_v23, %v1005_v20  ;;  %v1066_v26 = vadd.f32 %v1065_v24, %v1064_v21  ;;  %653 = vadd.xlane.f32.xlu1 %v619_v22 }
 0x1a5   : > { %v1008_v27 = vpop.f32.mrb[10].mxu0  ;;  %v1067_v28 = vpop.f32.mrb[10].mxu1  ;;  %v624_v29 = vadd.f32 %v1066_v26, %v1007_v25 }
 0x1a6   : > { %v1009_v30 = vpop.f32.mrb[11].mxu0  ;;  %v1068_v31 = vpop.f32.mrb[11].mxu1 }
 0x1a7   : > { %v1010_v32 = vadd.f32 %v1009_v30, %v1008_v27  ;;  %v1069_v33 = vadd.f32 %v1068_v31, %v1067_v28  ;;  %655 = vadd.xlane.f32.xlu0 %v624_v29 }
 0x1a9   : > { %v1011_v34 = vpop.f32.mrb[12].mxu0  ;;  %v1070_v35 = vpop.f32.mrb[12].mxu1  ;;  %v629_v36 = vadd.f32 %v1069_v33, %v1010_v32 }
 0x1aa   : > { %v1012_v37 = vpop.f32.mrb[13].mxu0  ;;  %v1071_v38 = vpop.f32.mrb[13].mxu1 }
 0x1ab   : > { %v1013_v39 = vadd.f32 %v1012_v37, %v1011_v34  ;;  %v1072_v40 = vadd.f32 %v1071_v38, %v1070_v35  ;;  %657 = vadd.xlane.f32.xlu1 %v629_v36 }
 0x1ad   : > { %v1014_v41 = vpop.f32.mrb[14].mxu0  ;;  %v1073_v42 = vpop.f32.mrb[14].mxu1  ;;  %v634_v43 = vadd.f32 %v1072_v40, %v1013_v39  ;;  %v1572_v40 = vld [vmem:[%s1670_s2] ss:$0 sm:$0xff] }
 0x1ae   : > { %v1015_v44 = vpop.f32.mrb[15].mxu0  ;;  %v1074_v45 = vpop.f32.mrb[15].mxu1 }
 0x1af   : > { %v1016_v46 = vadd.f32 %v1015_v44, %v1014_v41  ;;  %v1075_v47 = vadd.f32 %v1074_v45, %v1073_v42  ;;  %659 = vadd.xlane.f32.xlu0 %v634_v43  ;;  %v1577_v44 = vld [vmem:[%s1671_s3] ss:$0 sm:$0xff] }
 0x1b1   : > { %v1017_v48 = vpop.f32.mrb[16].mxu0  ;;  %v1076_v49 = vpop.f32.mrb[16].mxu1  ;;  %v639_v50 = vadd.f32 %v1075_v47, %v1016_v46 }
 0x1b2   : > { %v1018_v51 = vpop.f32.mrb[17].mxu0  ;;  %v1077_v52 = vpop.f32.mrb[17].mxu1 }
 0x1b3   : > { %v1019_v53 = vadd.f32 %v1018_v51, %v1017_v48  ;;  %v1078_v54 = vadd.f32 %v1077_v52, %v1076_v49  ;;  %661 = vadd.xlane.f32.xlu1 %v639_v50 }
 0x1b5   : > { %v644_v55 = vadd.f32 %v1078_v54, %v1019_v53 }
 0x1b7   : > { %663 = vadd.xlane.f32.xlu0 %v644_v55 }
 0x224   : > { %v648_v56 = vpop.xlane.xlu1 %647 }
 0x225   : > { %v666_v57 = vmul.f32 0.0078125, %v648_v56 }
 0x227   : > { %v675_v58 = vsub.f32 %v1530_v1, %v666_v57 }
 0x228   : > { %v650_v59 = vpop.xlane.xlu0 %649 }
 0x229   : > { %v667_v60 = vmul.f32 0.0078125, %v650_v59  ;;  %v684_v61 = vmul.f32 %v675_v58, %v675_v58 }
 0x22b   : > { %v1534_v62 = vsub.f32 %v609_v8, %v667_v60  ;;  %693 = vadd.xlane.f32.xlu1 %v684_v61 }
 0x22c   : > { %v652_v63 = vpop.xlane.xlu0 %651 }
 0x22d   : > { %v668_v0 = vmul.f32 0.0078125, %v652_v63  ;;  %v685_v2 = vmul.f32 %v1534_v62, %v1534_v62 }
 0x22f   : > { %v1538_v3 = vsub.f32 %v614_v15, %v668_v0  ;;  %695 = vadd.xlane.f32.xlu0 %v685_v2 }
 0x230   : > { %v654_v4 = vpop.xlane.xlu1 %653 }
 0x231   : > { %v669_v5 = vmul.f32 0.0078125, %v654_v4  ;;  %v686_v6 = vmul.f32 %v1538_v3, %v1538_v3 }
 0x233   : > { %v1542_v1 = vsub.f32 %v619_v22, %v669_v5  ;;  %697 = vadd.xlane.f32.xlu1 %v686_v6 }
 0x234   : > { %v656_v7 = vpop.xlane.xlu0 %655 }
 0x235   : > { %v670_v8 = vmul.f32 0.0078125, %v656_v7  ;;  %v687_v9 = vmul.f32 %v1542_v1, %v1542_v1 }
 0x237   : > { %v1546_v10 = vsub.f32 %v624_v29, %v670_v8  ;;  %699 = vadd.xlane.f32.xlu0 %v687_v9 }
 0x238   : > { %v658_v11 = vpop.xlane.xlu1 %657 }
 0x239   : > { %v671_v12 = vmul.f32 0.0078125, %v658_v11  ;;  %v688_v13 = vmul.f32 %v1546_v10, %v1546_v10 }
 0x23b   : > { %v1550_v14 = vsub.f32 %v629_v36, %v671_v12  ;;  %701 = vadd.xlane.f32.xlu1 %v688_v13 }
 0x23c   : > { %v660_v15 = vpop.xlane.xlu0 %659 }
 0x23d   : > { %v672_v16 = vmul.f32 0.0078125, %v660_v15  ;;  %v689_v17 = vmul.f32 %v1550_v14, %v1550_v14 }
 0x23f   : > { %v1554_v18 = vsub.f32 %v634_v43, %v672_v16  ;;  %703 = vadd.xlane.f32.xlu0 %v689_v17 }
 0x240   : > { %v662_v19 = vpop.xlane.xlu1 %661 }
 0x241   : > { %v673_v20 = vmul.f32 0.0078125, %v662_v19  ;;  %v690_v21 = vmul.f32 %v1554_v18, %v1554_v18 }
 0x243   : > { %v1558_v22 = vsub.f32 %v639_v50, %v673_v20  ;;  %705 = vadd.xlane.f32.xlu1 %v690_v21 }
 0x244   : > { %v664_v23 = vpop.xlane.xlu0 %663 }
 0x245   : > { %v674_v24 = vmul.f32 0.0078125, %v664_v23  ;;  %v691_v25 = vmul.f32 %v1558_v22, %v1558_v22 }
 0x247   : > { %v1562_v26 = vsub.f32 %v644_v55, %v674_v24  ;;  %707 = vadd.xlane.f32.xlu0 %v691_v25 }
 0x249   : > { %v692_v27 = vmul.f32 %v1562_v26, %v1562_v26 }
 0x24b   : > { %709 = vadd.xlane.f32.xlu1 %v692_v27 }
 0x2b8   : > { %v694_v28 = vpop.xlane.xlu1 %693 }
 0x2b9   : > { %v711_v29 = vmul.f32 0.0078125, %v694_v28 }
 0x2bb   : > { %v720_v30 = vadd.f32 1e-05, %v711_v29 }
 0x2bc   : > { %v696_v31 = vpop.xlane.xlu0 %695 }
 0x2bd   : > { %1202 = vrsqrt.f32 %v720_v30  ;;  %v712_v32 = vmul.f32 0.0078125, %v696_v31 }
 0x2bf   : > { %v721_v33 = vadd.f32 1e-05, %v712_v32 }
 0x2c0   : > { %v698_v34 = vpop.xlane.xlu1 %697 }
 0x2c1   : > { %1204 = vrsqrt.f32 %v721_v33  ;;  %v713_v35 = vmul.f32 0.0078125, %v698_v34 }
 0x2c3   : > { %v722_v36 = vadd.f32 1e-05, %v713_v35 }
 0x2c4   : > { %v700_v37 = vpop.xlane.xlu0 %699 }
 0x2c5   : > { %1206 = vrsqrt.f32 %v722_v36  ;;  %v714_v38 = vmul.f32 0.0078125, %v700_v37 }
 0x2c7   : > { %v1203_v39 = vpop.eup %1202  ;;  %v723_v41 = vadd.f32 1e-05, %v714_v38 }
 0x2c8   : > { %v738_v42 = vmul.f32 %v1203_v39, %v675_v58  ;;  %v702_v43 = vpop.xlane.xlu1 %701 }
 0x2c9   : > { %1208 = vrsqrt.f32 %v723_v41  ;;  %v715_v45 = vmul.f32 0.0078125, %v702_v43 }
 0x2ca   : > { %v754_v46 = vmul.f32 %v1572_v40, %v738_v42 }
 0x2cb   : > { %v1205_v47 = vpop.eup %1204  ;;  %v724_v48 = vadd.f32 1e-05, %v715_v45 }
 0x2cc   : > { %v770_v49 = vadd.f32 %v1577_v44, %v754_v46  ;;  %v739_v50 = vmul.f32 %v1205_v47, %v1534_v62  ;;  %v704_v51 = vpop.xlane.xlu0 %703 }
 0x2cd   : > { %1210 = vrsqrt.f32 %v724_v48  ;;  %v716_v52 = vmul.f32 0.0078125, %v704_v51 }
 0x2ce   : > { %779 = vst [vmem:[%s1582_s11] sm:$0xff] %v770_v49  ;;  %v755_v53 = vmul.f32 %v1572_v40, %v739_v50 }
 0x2cf   : > { %v1207_v54 = vpop.eup %1206  ;;  %v725_v55 = vadd.f32 1e-05, %v716_v52 }
 0x2d0   : > { %v771_v56 = vadd.f32 %v1577_v44, %v755_v53  ;;  %v740_v57 = vmul.f32 %v1207_v54, %v1538_v3  ;;  %v706_v58 = vpop.xlane.xlu1 %705 }
 0x2d1   : > { %1212 = vrsqrt.f32 %v725_v55  ;;  %v717_v59 = vmul.f32 0.0078125, %v706_v58 }
 0x2d2   : > { %780 = vst [vmem:[%s1582_s11 + $0x8] sm:$0xff] %v771_v56  ;;  %v756_v60 = vmul.f32 %v1572_v40, %v740_v57 }
 0x2d3   : > { %v1209_v61 = vpop.eup %1208  ;;  %v726_v62 = vadd.f32 1e-05, %v717_v59 }
 0x2d4   : > { %v772_v63 = vadd.f32 %v1577_v44, %v756_v60  ;;  %v741_v0 = vmul.f32 %v1209_v61, %v1542_v1  ;;  %v708_v2 = vpop.xlane.xlu0 %707 }
 0x2d5   : > { %1214 = vrsqrt.f32 %v726_v62  ;;  %v718_v4 = vmul.f32 0.0078125, %v708_v2 }
 0x2d6   : > { %781 = vst [vmem:[%s1582_s11 + $0x10] sm:$0xff] %v772_v63  ;;  %v757_v3 = vmul.f32 %v1572_v40, %v741_v0 }
 0x2d7   : > { %v1211_v5 = vpop.eup %1210  ;;  %v727_v6 = vadd.f32 1e-05, %v718_v4 }
 0x2d8   : > { %v773_v7 = vadd.f32 %v1577_v44, %v757_v3  ;;  %v742_v8 = vmul.f32 %v1211_v5, %v1546_v10  ;;  %v710_v9 = vpop.xlane.xlu1 %709 }
 0x2d9   : > { %1216 = vrsqrt.f32 %v727_v6  ;;  %v719_v11 = vmul.f32 0.0078125, %v710_v9 }
 0x2da   : > { %782 = vst [vmem:[%s1582_s11 + $0x18] sm:$0xff] %v773_v7  ;;  %v758_v1 = vmul.f32 %v1572_v40, %v742_v8 }
 0x2db   : > { %v1213_v12 = vpop.eup %1212  ;;  %v728_v13 = vadd.f32 1e-05, %v719_v11 }
 0x2dc   : > { %v774_v15 = vadd.f32 %v1577_v44, %v758_v1  ;;  %v743_v16 = vmul.f32 %v1213_v12, %v1550_v14 }
 0x2dd   : > { %1218 = vrsqrt.f32 %v728_v13 }
 0x2de   : > { %783 = vst [vmem:[%s1582_s11 + $0x20] sm:$0xff] %v774_v15  ;;  %v759_v10 = vmul.f32 %v1572_v40, %v743_v16 }
 0x2df   : > { %v1215_v17 = vpop.eup %1214 }
 0x2e0   : > { %v775_v19 = vadd.f32 %v1577_v44, %v759_v10  ;;  %v744_v20 = vmul.f32 %v1215_v17, %v1554_v18 }
 0x2e2   : > { %784 = vst [vmem:[%s1582_s11 + $0x28] sm:$0xff] %v775_v19  ;;  %v760_v21 = vmul.f32 %v1572_v40, %v744_v20 }
 0x2e3   : > { %v1217_v23 = vpop.eup %1216 }
 0x2e4   : > { %v776_v24 = vadd.f32 %v1577_v44, %v760_v21  ;;  %v745_v14 = vmul.f32 %v1217_v23, %v1558_v22 }
 0x2e6   : > { %785 = vst [vmem:[%s1582_s11 + $0x30] sm:$0xff] %v776_v24  ;;  %v761_v25 = vmul.f32 %v1572_v40, %v745_v14 }
 0x2e7   : > { %v1219_v27 = vpop.eup %1218 }
 0x2e8   : > { %v777_v28 = vadd.f32 %v1577_v44, %v761_v25  ;;  %v746_v18 = vmul.f32 %v1219_v27, %v1562_v26 }
 0x2ea   : > { %786 = vst [vmem:[%s1582_s11 + $0x38] sm:$0xff] %v777_v28  ;;  %v762_v29 = vmul.f32 %v1572_v40, %v746_v18 }
 0x2ec   : > { %v778_v22 = vadd.f32 %v1577_v44, %v762_v29 }
 0x2ee   : > { %787 = vst [vmem:[%s1582_s11 + $0x40] sm:$0xff] %v778_v22 }
 0x2ef   : > { %1261 = shalt.err (!%p1258_p7)
}
 0x2f0   : > { %s1262_s29 = scalar_lea.hbm %s1619_s22, 1152  ;;  %s1266_s7 = scalar_lea.hbm %s1672_s4, 2304 }
 0x2f1   : > { %p1263_p8 = scmp.ne.s32.totalorder %s1619_s22, %s1262_s29  ;;  %p1267_p1 = scmp.lt.u32.totalorder %s1619_s22, %s1672_s4 }
 0x2f2   : > { %p1268_p0 = scmp.lt.u32.totalorder %s1266_s7, %s1262_s29  ;;  %p1270_p6 = scmp.lt.u32.totalorder %s1262_s29, %s1619_s22 }
 0x2f3   : > { %p1264_p11 = pnand %p1263_p8, %p1683_p9 }
 0x2f4   : > { %p1269_p5 = por %p1268_p0, %p1267_p1 }
 0x2f5   : > { %p1265_p13 = pneg %p1264_p11 }
 0x2f6   : > { %p1271_p10 = por %p1270_p6, %p1269_p5 }
 0x2f8   : > { %p1272_p12 = pnand %p1271_p10, %p1265_p13 }
 0x2fa   : > { %1275 = shalt.err (!%p1272_p12)
}
 0x2fb   : > { %s1322_s10 = smov 128   ;;  %s1323_s11 = smov 8  }
 0x2fc   : > { %1148 = dma.vmem_to_hbm [thread:$0]  (%p1683_p9), %s1622_s13, 1152, %s1619_s22, %s1627_s19, %s1322_s10, %s1322_s10, %s1323_s11  }
 0x2fd PF: > { %p1160_p2 = scmp.ge.s32.totalorder %s1314_s18, 2  ;;  %s817_s12 = sand.u32 1, %s1302_s15  }
 0x2fe   : > { %p1684_p3 = scmp.ne.s32.totalorder %s1677_s26, 0  ;;  %s818_s14 = scalar_lea.sflag [#allocation4], %s817_s12 }
 0x300   : > { %p1155_p4 = pnand %p1160_p2, %p1684_p3 }
 0x302   : > { %1297 = dma.done.wait (!%p1155_p4), %s818_s14, 1152  }
 0x303   : > { %1299 = vsyncadd (!%p1155_p4), %s818_s14, 4294966144  ;;  %p15_p7 = scmp.ge.s32.totalorder %s1374_s21, 4   ;;  %s1685_s15 = smov %s1306_s16 }
 0x304   : > { %s1686_s16 = smov %s1310_s17  ;;  %s1687_s17 = smov %s1385_s24 }
 0x305   : > { %s1688_s18 = smov %s1374_s21  ;;  %17 = sbr.rel (!%p15_p7) target bundleno = 4 (0x4), region = 76 }
 0x30c   :  { %823 = vsyncpa [#allocation3], 1 }
 0x30d   :  { %825 = vsyncpa [#allocation3 + $0x1], 1 }
 0x30e   :  { %826 = vsyncpa [#allocation4], 1 }
 0x30f   :  { %828 = vsyncpa [#allocation4 + $0x1], 1 }

</bundles_post_ra>
